<compile_context>
chip_gen: v7x
topology: tpu7x:2x2x1
jax: 0.10.0
libtpu: 0.0.40
codegen_flags: <defaults>
</compile_context>

<pallas_src>
import math
from functools import partial

import jax
import jax.numpy as jnp
from jax.experimental import pallas as pl
from jax.experimental.pallas import tpu as pltpu


# ----------------------- module config (mirrors __init__) -----------------------
INPUT_DIM = 4
INPUT_LEN = 8
OUTPUT_DIM = 4
OUTPUT_LEN = 4
ACTIVATION = "tanh"
KERNEL_HIDDEN_LAYER = 1          # one hidden layer -> Linear, Tanh, Dropout, Linear
DROP_OUT_P = 0.01                # eval mode => identity

IN_SIZE = INPUT_LEN * INPUT_DIM              # 32
OUT_SIZE = OUTPUT_LEN * OUTPUT_DIM           # 16
IS_IN_ENCODER = INPUT_LEN >= OUTPUT_LEN      # True here

if IS_IN_ENCODER:
    _gap = int((IN_SIZE - OUT_SIZE) / (KERNEL_HIDDEN_LAYER + 1))
    HIDDEN_SIZES = [IN_SIZE - i * _gap for i in range(1, KERNEL_HIDDEN_LAYER + 1)]
else:
    _gap = int((OUT_SIZE - IN_SIZE) / (KERNEL_HIDDEN_LAYER + 1))
    HIDDEN_SIZES = [IN_SIZE + i * _gap for i in range(1, KERNEL_HIDDEN_LAYER + 1)]

# layer dims: [in_size] + hidden_size_list + [out_size]
LAYER_DIMS = [IN_SIZE] + HIDDEN_SIZES + [OUT_SIZE]
NUM_LINEAR = len(LAYER_DIMS) - 1             # kernel_hidden_layer + 1

# ----------------------- tiling / packing config ---------------------------------
PACK = 8                          # batch rows packed per lane-dense view row (8*16=128 out lanes)
_TILE_B_TARGET = 32768            # original batch rows per grid step (multiple of PACK)
_MIN_PALLAS_BATCH = 512           # below this, plain XLA fusion beats kernel launch cost
_VMEM_LIMIT_BYTES = 40 * 1024 * 1024   # ~20 MiB live at TILE_B=32768; safe on v5e/v6e/v7x


# ----------------------------- parameter init -----------------------------------
def init_params(key):
    """Deterministic init mimicking torch.nn.Linear default (U(-1/sqrt(fan_in), +))."""
    params = []
    for li in range(NUM_LINEAR):
        fan_in, fan_out = LAYER_DIMS[li], LAYER_DIMS[li + 1]
        key, kw, kb = jax.random.split(key, 3)
        bound = 1.0 / math.sqrt(fan_in)
        # store W as (fan_in, fan_out) so the kernel does x @ W  (== x @ W_torch.T)
        # NOTE: torch nn.Linear weights are (fan_out, fan_in); transpose when importing.
        w = jax.random.uniform(kw, (fan_in, fan_out), jnp.float32, -bound, bound)
        b = jax.random.uniform(kb, (1, fan_out), jnp.float32, -bound, bound)
        params.append((w, b))
    return params


def _pack_params(params):
    """Expand each (W, b) to block-diagonal / tiled form for the lane-dense views.

    W (fan_in, fan_out)  ->  kron(I_PACK, W)  (PACK*fan_in, PACK*fan_out)
    b (1, fan_out)       ->  tile(b, PACK)    (1, PACK*fan_out)

    With the input viewed as (B/PACK, PACK*IN_SIZE), each view row holds PACK
    independent batch rows in its lanes; the block-diagonal weights apply the
    original linear layer to each of them simultaneously, keeping every
    intermediate fully lane-dense.  Tiny one-time cost (weights are <200 KiB).
    """
    eye = jnp.eye(PACK, dtype=jnp.float32)
    flat = []
    for w, b in params:
        flat.append(jnp.kron(eye, w.astype(jnp.float32)))
        flat.append(jnp.tile(b.astype(jnp.float32), (1, PACK)))
    return flat


# ------------------------------ Pallas kernel ------------------------------------
def _mlp_kernel(*refs, num_linear, activation):
    # refs = (x_ref, W0_blk, b0_blk, W1_blk, b1_blk, ..., o_ref)
    # x_ref: (tile_rows, PACK*IN_SIZE) lane-dense block; o_ref: (tile_rows, PACK*OUT_SIZE).
    x_ref = refs[0]
    o_ref = refs[-1]
    wb_refs = refs[1:-1]

    h = x_ref[...]
    for i in range(num_linear):
        w = wb_refs[2 * i][...]
        b = wb_refs[2 * i + 1][...]
        # Block-diagonal matmul: dense in lanes, f32 accumulation on the MXU.
        h = jnp.dot(h, w, preferred_element_type=jnp.float32) + b
        if i < num_linear - 1:
            if activation == "relu":
                h = jnp.maximum(h, 0.0)
            elif activation == "tanh":
                h = jnp.tanh(h)          # EUP — effectively free next to DMA/MXU
            # Dropout(p) in eval mode is identity -> nothing to do.
    o_ref[...] = h.astype(o_ref.dtype)   # full-width (>=128 lanes) unmasked stores


# ------------------------------ pure-JAX fallback ---------------------------------
def _mlp_jnp(x2, params):
    h = x2.astype(jnp.float32)
    for i, (w, b) in enumerate(params):
        h = h @ w + b
        if i < NUM_LINEAR - 1:
            h = jnp.tanh(h) if ACTIVATION.lower() == "tanh" else jnp.maximum(h, 0.0)
    return h


# --------------------------------- wrapper ----------------------------------------
def linear_forward(x, params, *, force_pallas=False):
    """x: (batch, input_len, input_dim) float32 -> (batch, output_len, output_dim)."""
    x2 = x.reshape(-1, IN_SIZE).astype(jnp.float32)      # glue reshape (plain JAX, free)
    batch = x2.shape[0]

    # Tiny-batch bypass: launch + DMA setup dwarfs ~2.3 KFLOP/row of work.
    if batch < _MIN_PALLAS_BATCH and not force_pallas:
        return _mlp_jnp(x2, params).reshape(-1, OUTPUT_LEN, OUTPUT_DIM)

    # Pad only to a multiple of PACK (8); this is the only copy, and only when needed.
    pad = (-batch) % PACK
    if pad:
        x2 = jnp.pad(x2, ((0, pad), (0, 0)))
    padded = batch + pad

    # Lane-dense views (contiguous reshapes -> free bitcasts, no HBM pass).
    rows = padded // PACK
    x_view = x2.reshape(rows, PACK * IN_SIZE)            # (rows, 256)

    tile_rows = min(_TILE_B_TARGET // PACK, rows)        # full extent or multiple of 8
    grid = (pl.cdiv(rows, tile_rows),)                   # ragged last block masked by Pallas

    flat_params = _pack_params(params)

    # x/out tiles march with the grid; weights/biases stay resident (block index (0, 0)).
    in_specs = [pl.BlockSpec((tile_rows, PACK * IN_SIZE), lambda i: (i, 0))]
    for p in flat_params:
        in_specs.append(pl.BlockSpec(p.shape, lambda i: (0, 0)))
    out_spec = pl.BlockSpec((tile_rows, PACK * OUT_SIZE), lambda i: (i, 0))

    weight_bytes = sum(int(p.size) * p.dtype.itemsize for p in flat_params)
    cost = pl.CostEstimate(
        flops=2 * padded * sum(LAYER_DIMS[i] * LAYER_DIMS[i + 1] for i in range(NUM_LINEAR)),
        transcendentals=padded * sum(HIDDEN_SIZES),
        bytes_accessed=padded * (IN_SIZE + OUT_SIZE) * 4 + weight_bytes,
    )

    kernel = partial(_mlp_kernel, num_linear=NUM_LINEAR, activation=ACTIVATION.lower())

    y_view = pl.pallas_call(
        kernel,
        out_shape=jax.ShapeDtypeStruct((rows, PACK * OUT_SIZE), jnp.float32),
        grid=grid,
        in_specs=in_specs,
        out_specs=out_spec,
        compiler_params=pltpu.CompilerParams(
            dimension_semantics=("parallel",),
            vmem_limit_bytes=_VMEM_LIMIT_BYTES,
        ),
        cost_estimate=cost,
    )(x_view, *flat_params)

    y2 = y_view.reshape(padded, OUT_SIZE)                # free bitcast back
    if pad:
        y2 = y2[:batch]                                  # only when batch % 8 != 0
    return y2.reshape(-1, OUTPUT_LEN, OUTPUT_DIM)        # glue reshape (plain JAX)


# ------------------------------- reference ---------------------------------------
def linear_forward_ref(x, params):
    h = x.reshape(-1, IN_SIZE).astype(jnp.float32)
    for i, (w, b) in enumerate(params):
        h = h @ w + b
        if i < NUM_LINEAR - 1:
            h = jnp.tanh(h) if ACTIVATION.lower() == "tanh" else jnp.maximum(h, 0.0)
    return h.reshape(-1, OUTPUT_LEN, OUTPUT_DIM)


# --------------------------------- main -------------------------------------------
if __name__ == "__main__":
    key = jax.random.PRNGKey(0)
    key, kx_small, kx_med, kx_big = jax.random.split(key, 4)

    params = init_params(key)

    # Small test (module-sized input) — forced through the Pallas kernel; exercises
    # the pad-to-8 path and a single full-extent block.
    x_small = jax.random.normal(kx_small, (2, INPUT_LEN, INPUT_DIM), dtype=jnp.float32)
    out_small = jax.block_until_ready(linear_forward(x_small, params, force_pallas=True))
    ref_small = linear_forward_ref(x_small, params)
    assert out_small.shape == (2, OUTPUT_LEN, OUTPUT_DIM), out_small.shape
    assert jnp.allclose(out_small, ref_small, atol=1e-5, rtol=1e-5), "small-batch mismatch"

    # Medium test — batch not a multiple of 8 (pad path), single-tile grid.
    x_med = jax.random.normal(kx_med, (1003, INPUT_LEN, INPUT_DIM), dtype=jnp.float32)
    out_med = jax.block_until_ready(linear_forward(x_med, params))
    ref_med = linear_forward_ref(x_med, params)
    assert out_med.shape == (1003, OUTPUT_LEN, OUTPUT_DIM), out_med.shape
    assert jnp.allclose(out_med, ref_med, atol=1e-5, rtol=1e-5), "medium-batch mismatch"

    # Large test — multiple of 8 but NOT a multiple of the tile: zero pad/slice copies,
    # multi-tile grid, resident weights, ragged last block.
    big_batch = 2 * _TILE_B_TARGET + 1024
    x_big = jax.random.normal(kx_big, (big_batch, INPUT_LEN, INPUT_DIM), dtype=jnp.float32)
    out_big = jax.block_until_ready(linear_forward(x_big, params))
    ref_big = linear_forward_ref(x_big, params)
    assert out_big.shape == (big_batch, OUTPUT_LEN, OUTPUT_DIM), out_big.shape
    assert jnp.allclose(out_big, ref_big, atol=1e-5, rtol=1e-5), "large-batch mismatch"

    print("KERNEL_OK")
</pallas_src>

<mosaic_0001>
module attributes {stable_mosaic.version = 11 : i64} {
  func.func @_mlp_kernel(%arg0: i32, %arg1: memref<1x256xf32, #tpu.memory_space<vmem>>, %arg2: memref<256x192xf32, #tpu.memory_space<vmem>>, %arg3: memref<1x192xf32, #tpu.memory_space<vmem>>, %arg4: memref<192x128xf32, #tpu.memory_space<vmem>>, %arg5: memref<1x128xf32, #tpu.memory_space<vmem>>, %arg6: memref<1x128xf32, #tpu.memory_space<vmem>>) attributes {dimension_semantics = [#tpu.dimension_semantics<parallel>], iteration_bounds = array<i64: 1>, scalar_prefetch = 0 : i64, scratch_operands = 0 : i64, tpu.core_type = #tpu.core_type<tc>, window_params = [{transform_indices = @transform_0, window_bounds = array<i64: 1, 256>}, {pipeline_mode = #tpu.pipeline_mode<synchronous>, transform_indices = @transform_1, window_bounds = array<i64: 256, 192>}, {pipeline_mode = #tpu.pipeline_mode<synchronous>, transform_indices = @transform_2, window_bounds = array<i64: 1, 192>}, {pipeline_mode = #tpu.pipeline_mode<synchronous>, transform_indices = @transform_3, window_bounds = array<i64: 192, 128>}, {pipeline_mode = #tpu.pipeline_mode<synchronous>, transform_indices = @transform_4, window_bounds = array<i64: 1, 128>}, {transform_indices = @transform_5, window_bounds = array<i64: 1, 128>}]} {
    %c0 = arith.constant 0 : index
    %c0_0 = arith.constant 0 : index
    %0 = vector.load %arg1[%c0, %c0_0] : memref<1x256xf32, #tpu.memory_space<vmem>>, vector<1x256xf32>
    %c0_1 = arith.constant 0 : index
    %c0_2 = arith.constant 0 : index
    %1 = vector.load %arg2[%c0_1, %c0_2] : memref<256x192xf32, #tpu.memory_space<vmem>>, vector<256x192xf32>
    %c0_3 = arith.constant 0 : index
    %c0_4 = arith.constant 0 : index
    %2 = vector.load %arg3[%c0_3, %c0_4] : memref<1x192xf32, #tpu.memory_space<vmem>>, vector<1x192xf32>
    %cst = arith.constant dense<0.000000e+00> : vector<1x192xf32>
    %3 = tpu.matmul %0, %1, %cst {dimension_numbers = #tpu.dot_dimension_numbers<[1], [0], [0], [1], [0, 0, 1, 1], [], []>} : vector<1x256xf32>, vector<256x192xf32>, vector<1x192xf32> -> vector<1x192xf32>
    %4 = arith.addf %3, %2 : vector<1x192xf32>
    %5 = math.tanh %4 : vector<1x192xf32>
    %c0_5 = arith.constant 0 : index
    %c0_6 = arith.constant 0 : index
    %6 = vector.load %arg4[%c0_5, %c0_6] : memref<192x128xf32, #tpu.memory_space<vmem>>, vector<192x128xf32>
    %c0_7 = arith.constant 0 : index
    %c0_8 = arith.constant 0 : index
    %7 = vector.load %arg5[%c0_7, %c0_8] : memref<1x128xf32, #tpu.memory_space<vmem>>, vector<1x128xf32>
    %cst_9 = arith.constant dense<0.000000e+00> : vector<1x128xf32>
    %8 = tpu.matmul %5, %6, %cst_9 {dimension_numbers = #tpu.dot_dimension_numbers<[1], [0], [0], [1], [0, 0, 1, 1], [], []>} : vector<1x192xf32>, vector<192x128xf32>, vector<1x128xf32> -> vector<1x128xf32>
    %9 = arith.addf %8, %7 : vector<1x128xf32>
    %c0_10 = arith.constant 0 : index
    %c0_11 = arith.constant 0 : index
    %10 = vector.load %arg6[%c0_10, %c0_11] : memref<1x128xf32, #tpu.memory_space<vmem>>, vector<1x128xf32>
    tpu.vector_store %arg6[%c0_10, %c0_11], %9 {strides = array<i32>} : memref<1x128xf32, #tpu.memory_space<vmem>>, vector<1x128xf32>,
    return
  }
  func.func @transform_0(%arg0: i32) -> (i32, i32) {
    %c0_i32 = arith.constant 0 : i32
    %c0_i32_0 = arith.constant 0 : i32
    return %arg0, %c0_i32 : i32, i32
  }
  func.func @transform_1(%arg0: i32) -> (i32, i32) {
    %c0_i32 = arith.constant 0 : i32
    %c0_i32_0 = arith.constant 0 : i32
    %c0_i32_1 = arith.constant 0 : i32
    return %c0_i32, %c0_i32_0 : i32, i32
  }
  func.func @transform_2(%arg0: i32) -> (i32, i32) {
    %c0_i32 = arith.constant 0 : i32
    %c0_i32_0 = arith.constant 0 : i32
    %c0_i32_1 = arith.constant 0 : i32
    return %c0_i32, %c0_i32_0 : i32, i32
  }
  func.func @transform_3(%arg0: i32) -> (i32, i32) {
    %c0_i32 = arith.constant 0 : i32
    %c0_i32_0 = arith.constant 0 : i32
    %c0_i32_1 = arith.constant 0 : i32
    return %c0_i32, %c0_i32_0 : i32, i32
  }
  func.func @transform_4(%arg0: i32) -> (i32, i32) {
    %c0_i32 = arith.constant 0 : i32
    %c0_i32_0 = arith.constant 0 : i32
    %c0_i32_1 = arith.constant 0 : i32
    return %c0_i32, %c0_i32_0 : i32, i32
  }
  func.func @transform_5(%arg0: i32) -> (i32, i32) {
    %c0_i32 = arith.constant 0 : i32
    %c0_i32_0 = arith.constant 0 : i32
    return %arg0, %c0_i32 : i32, i32
  }
}

</mosaic_0001>

<bundles_post_ra>
// kernel: tpu_custom_call.1
= control target key start
LH: loop header
LB: loop body
LE: loop exit
PB: predicated region body
PF: predicated region fallthrough
CT: control target
= control target key end

     0   :  { %v427_v7 = vmov 0.0|0.0   ;;  %v88_v26 = vlaneseq  ;;  %s768_s0 = inlined_call_operand.vmem [shape: f32[1,256], index: 0, kind: input, shape index: {}]   ;;  %s769_s1 = inlined_call_operand.vmem [shape: f32[256,192], index: 1, kind: input, shape index: {}]   ;;  %s770_s2 = inlined_call_operand.vmem [shape: f32[1,192], index: 2, kind: input, shape index: {}]   ;;  %s771_s3 = inlined_call_operand.vmem [shape: f32[192,128], index: 3, kind: input, shape index: {}]   ;;  %s772_s4 = inlined_call_operand.vmem [shape: f32[1,128], index: 4, kind: input, shape index: {}]   ;;  %s773_s5 = inlined_call_operand.hbm [shape: f32[1,128], index: 5, kind: output, shape index: {}]  }
   0x1   :  { %v23_v0 = vld [vmem:[%s769_s1 + $0x8] sm:$0xff]  ;;  %v25_v1 = vld [vmem:[%s769_s1 + $0x18] sm:$0xff]  ;;  %v22_v2 = vld [vmem:[%s769_s1] sm:$0xff]  ;;  %361 = vmatprep.subr.bf16.mxu1 %v427_v7 }
   0x2   :  { %v297_v3 = vpack.c.bf16 %v25_v1, %v23_v0  ;;  %v24_v4 = vld [vmem:[%s769_s1 + $0x10] sm:$0xff]  ;;  %v27_v5 = vld [vmem:[%s769_s1 + $0x28] sm:$0xff]  ;;  %v29_v6 = vld [vmem:[%s769_s1 + $0x38] sm:$0xff]  ;;  %v526_v33 = vshrl.u32 %v88_v26, 7 }
   0x3   :  { %v299_v8 = vpack.c.bf16 %v24_v4, %v22_v2  ;;  %v301_v9 = vpack.c.bf16 %v29_v6, %v27_v5  ;;  %v26_v10 = vld [vmem:[%s769_s1 + $0x20] sm:$0xff]  ;;  %v28_v11 = vld [vmem:[%s769_s1 + $0x30] sm:$0xff]  ;;  %v31_v12 = vld [vmem:[%s769_s1 + $0x48] sm:$0xff] }
   0x4   :  { %298 = vmatprep.subr.bf16.mxu0 %v297_v3  ;;  %v33_v13 = vld [vmem:[%s769_s1 + $0x58] sm:$0xff]  ;;  %v303_v14 = vpack.c.bf16 %v28_v11, %v26_v10  ;;  %v30_v16 = vld [vmem:[%s769_s1 + $0x40] sm:$0xff]  ;;  %v32_v17 = vld [vmem:[%s769_s1 + $0x50] sm:$0xff]  ;;  %v94_v40 = vsub.s32 1, %v526_v33 }
   0x5   :  { %300 = vmatpush1.bf16.msra.mxu0 %v299_v8  ;;  %v305_v15 = vpack.c.bf16 %v33_v13, %v31_v12  ;;  %v35_v18 = vld [vmem:[%s769_s1 + $0x68] sm:$0xff]  ;;  %v37_v19 = vld [vmem:[%s769_s1 + $0x78] sm:$0xff]  ;;  %v307_v20 = vpack.c.bf16 %v32_v17, %v30_v16  ;;  %v34_v22 = vld [vmem:[%s769_s1 + $0x60] sm:$0xff] }
   0x6   :  { %302 = vmatprep.subr.bf16.mxu0 %v301_v9  ;;  %v309_v21 = vpack.c.bf16 %v37_v19, %v35_v18  ;;  %v36_v23 = vld [vmem:[%s769_s1 + $0x70] sm:$0xff]  ;;  %v39_v24 = vld [vmem:[%s769_s1 + $0x88] sm:$0xff]  ;;  %v41_v25 = vld [vmem:[%s769_s1 + $0x98] sm:$0xff] }
   0x7   :  { %v311_v27 = vpack.c.bf16 %v36_v23, %v34_v22  ;;  %v313_v28 = vpack.c.bf16 %v41_v25, %v39_v24  ;;  %v38_v29 = vld [vmem:[%s769_s1 + $0x80] sm:$0xff]  ;;  %v40_v30 = vld [vmem:[%s769_s1 + $0x90] sm:$0xff]  ;;  %v43_v31 = vld [vmem:[%s769_s1 + $0xa8] sm:$0xff] }
   0x8   :  { %v45_v32 = vld [vmem:[%s769_s1 + $0xb8] sm:$0xff]  ;;  %v315_v34 = vpack.c.bf16 %v40_v30, %v38_v29  ;;  %v42_v36 = vld [vmem:[%s769_s1 + $0xa0] sm:$0xff]  ;;  %v44_v37 = vld [vmem:[%s769_s1 + $0xb0] sm:$0xff] }
   0x9   :  { %304 = vmatpush1.bf16.msra.mxu0 %v303_v14  ;;  %v317_v35 = vpack.c.bf16 %v45_v32, %v43_v31  ;;  %v47_v38 = vld [vmem:[%s769_s1 + $0xc8] sm:$0xff]  ;;  %v49_v39 = vld [vmem:[%s769_s1 + $0xd8] sm:$0xff]  ;;  %v319_v41 = vpack.c.bf16 %v44_v37, %v42_v36  ;;  %v46_v42 = vld [vmem:[%s769_s1 + $0xc0] sm:$0xff] }
   0xa   :  { %306 = vmatprep.subr.bf16.mxu0 %v305_v15  ;;  %v48_v43 = vld [vmem:[%s769_s1 + $0xd0] sm:$0xff]  ;;  %v51_v44 = vld [vmem:[%s769_s1 + $0xe8] sm:$0xff]  ;;  %v321_v45 = vpack.c.bf16 %v49_v39, %v47_v38  ;;  %v53_v46 = vld [vmem:[%s769_s1 + $0xf8] sm:$0xff] }
   0xb   :  { %v556_v47 = vld [vmem:[%s768_s0] sm:$0x3]  ;;  %v183_v50 = vld [vmem:[%s771_s3 + $0x8] sm:$0xff]  ;;  %v184_v51 = vld [vmem:[%s771_s3 + $0x10] sm:$0xff]  ;;  %v323_v54 = vpack.c.bf16 %v48_v43, %v46_v42  ;;  %v325_v55 = vpack.c.bf16 %v53_v46, %v51_v44 }
   0xc   :  { %v182_v48 = vld [vmem:[%s771_s3] sm:$0xff]  ;;  %v95_v49 = vrot.slane %v556_v47, %v94_v40  ;;  %v185_v52 = vld [vmem:[%s771_s3 + $0x18] sm:$0xff]  ;;  %v52_v57 = vld [vmem:[%s769_s1 + $0xf0] sm:$0xff] }
   0xd   :  { %308 = vmatpush1.bf16.msra.mxu0 %v307_v20  ;;  %v362_v53 = vpack.c.bf16 %v183_v50, %v182_v48  ;;  %v50_v56 = vld [vmem:[%s769_s1 + $0xe0] sm:$0xff]  ;;  %v55_v58 = vld [vmem:[%s769_s1 + $0x108] sm:$0xff]  ;;  %v365_v59 = vpack.c.bf16 %v185_v52, %v184_v51  ;;  %v57_v60 = vld [vmem:[%s769_s1 + $0x118] sm:$0xff] }
   0xe   :  { %310 = vmatprep.subr.bf16.mxu0 %v309_v21  ;;  %173 = vmatprep.mubr.f32.mxu0 %v95_v49  ;;  %v186_v61 = vld [vmem:[%s771_s3 + $0x20] sm:$0xff]  ;;  %v187_v62 = vld [vmem:[%s771_s3 + $0x28] sm:$0xff] }
   0xf   :  { %363 = vmatpush1.bf16.msra.mxu1 %v362_v53 }
  0x10   :  { %364 = vmatprep.subr.bf16.mxu1 %v427_v7 }
  0x11   :  { %312 = vmatpush1.bf16.msra.mxu0 %v311_v27 }
  0x12   :  { %314 = vmatprep.subr.bf16.mxu0 %v313_v28 }
  0x15   :  { %316 = vmatpush1.bf16.msra.mxu0 %v315_v34 }
  0x16   :  { %318 = vmatprep.subr.bf16.mxu0 %v317_v35 }
  0x19   :  { %320 = vmatpush1.bf16.msra.mxu0 %v319_v41 }
  0x1a   :  { %322 = vmatprep.subr.bf16.mxu0 %v321_v45 }
  0x1b   :  { %10 = vsyncpa [#allocation3], 0  ;;  %v327_v63 = vpack.c.bf16 %v52_v57, %v50_v56  ;;  %v329_v0 = vpack.c.bf16 %v57_v60, %v55_v58  ;;  %v54_v1 = vld [vmem:[%s769_s1 + $0x100] sm:$0xff]  ;;  %v56_v2 = vld [vmem:[%s769_s1 + $0x110] sm:$0xff]  ;;  %366 = vmatpush1.bf16.msra.mxu1 %v365_v59  ;;  %v368_v4 = vpack.c.bf16 %v187_v62, %v186_v61  ;;  %vm207_vm0 = vcmask 523264  }
  0x1c   :  { %v59_v3 = vld [vmem:[%s769_s1 + $0x128] sm:$0xff]  ;;  %v61_v5 = vld [vmem:[%s769_s1 + $0x138] sm:$0xff]  ;;  %367 = vmatprep.subr.bf16.mxu1 %v427_v7  ;;  %v188_v6 = vld [vmem:[%s771_s3 + $0x30] sm:$0xff]  ;;  %v331_v9 = vpack.c.bf16 %v56_v2, %v54_v1  ;;  %v90_v1 = vsub.s32 0, %v526_v33 }
  0x1d   :  { %324 = vmatpush1.bf16.msra.mxu0 %v323_v54  ;;  %v189_v8 = vld [vmem:[%s771_s3 + $0x38] sm:$0xff]  ;;  %v333_v10 = vpack.c.bf16 %v61_v5, %v59_v3  ;;  %v58_v11 = vld [vmem:[%s769_s1 + $0x120] sm:$0xff]  ;;  %v60_v12 = vld [vmem:[%s769_s1 + $0x130] sm:$0xff] }
  0x1e   :  { %326 = vmatprep.subr.bf16.mxu0 %v325_v55  ;;  %v63_v13 = vld [vmem:[%s769_s1 + $0x148] sm:$0xff]  ;;  %v371_v14 = vpack.c.bf16 %v189_v8, %v188_v6  ;;  %v65_v15 = vld [vmem:[%s769_s1 + $0x158] sm:$0xff]  ;;  %v190_v16 = vld [vmem:[%s771_s3 + $0x40] sm:$0xff]  ;;  %v335_v18 = vpack.c.bf16 %v60_v12, %v58_v11  ;;  %v91_v3 = vrot.slane %v556_v47, %v90_v1 }
  0x1f   :  { %369 = vmatpush1.bf16.msra.mxu1 %v368_v4  ;;  %v191_v17 = vld [vmem:[%s771_s3 + $0x48] sm:$0xff]  ;;  %v337_v19 = vpack.c.bf16 %v65_v15, %v63_v13  ;;  %v62_v20 = vld [vmem:[%s769_s1 + $0x140] sm:$0xff]  ;;  %v64_v21 = vld [vmem:[%s769_s1 + $0x150] sm:$0xff] }
  0x20   :  { %370 = vmatprep.subr.bf16.mxu1 %v427_v7  ;;  %v67_v22 = vld [vmem:[%s769_s1 + $0x168] sm:$0xff]  ;;  %v374_v23 = vpack.c.bf16 %v191_v17, %v190_v16  ;;  %v69_v24 = vld [vmem:[%s769_s1 + $0x178] sm:$0xff]  ;;  %v192_v25 = vld [vmem:[%s771_s3 + $0x50] sm:$0xff]  ;;  %v339_v27 = vpack.c.bf16 %v64_v21, %v62_v20 }
  0x21   :  { %328 = vmatpush1.bf16.msra.mxu0 %v327_v63  ;;  %v193_v26 = vld [vmem:[%s771_s3 + $0x58] sm:$0xff]  ;;  %v341_v28 = vpack.c.bf16 %v69_v24, %v67_v22  ;;  %v66_v29 = vld [vmem:[%s769_s1 + $0x160] sm:$0xff]  ;;  %v68_v30 = vld [vmem:[%s769_s1 + $0x170] sm:$0xff] }
  0x22   :  { %330 = vmatprep.subr.bf16.mxu0 %v329_v0  ;;  %v71_v31 = vld [vmem:[%s769_s1 + $0x188] sm:$0xff]  ;;  %v377_v32 = vpack.c.bf16 %v193_v26, %v192_v25  ;;  %v73_v34 = vld [vmem:[%s769_s1 + $0x198] sm:$0xff]  ;;  %v194_v35 = vld [vmem:[%s771_s3 + $0x60] sm:$0xff]  ;;  %v343_v37 = vpack.c.bf16 %v68_v30, %v66_v29 }
  0x23   :  { %372 = vmatpush1.bf16.msra.mxu1 %v371_v14  ;;  %v195_v36 = vld [vmem:[%s771_s3 + $0x68] sm:$0xff]  ;;  %v345_v38 = vpack.c.bf16 %v73_v34, %v71_v31  ;;  %v70_v39 = vld [vmem:[%s769_s1 + $0x180] sm:$0xff]  ;;  %v72_v41 = vld [vmem:[%s769_s1 + $0x190] sm:$0xff] }
  0x24   :  { %373 = vmatprep.subr.bf16.mxu1 %v427_v7  ;;  %v75_v42 = vld [vmem:[%s769_s1 + $0x1a8] sm:$0xff]  ;;  %v380_v43 = vpack.c.bf16 %v195_v36, %v194_v35  ;;  %v77_v44 = vld [vmem:[%s769_s1 + $0x1b8] sm:$0xff]  ;;  %v196_v45 = vld [vmem:[%s771_s3 + $0x70] sm:$0xff]  ;;  %v347_v48 = vpack.c.bf16 %v72_v41, %v70_v39 }
  0x25   :  { %332 = vmatpush1.bf16.msra.mxu0 %v331_v9  ;;  %v197_v46 = vld [vmem:[%s771_s3 + $0x78] sm:$0xff]  ;;  %v349_v49 = vpack.c.bf16 %v77_v44, %v75_v42  ;;  %v74_v50 = vld [vmem:[%s769_s1 + $0x1a0] sm:$0xff]  ;;  %v76_v51 = vld [vmem:[%s769_s1 + $0x1b0] sm:$0xff] }
  0x26   :  { %334 = vmatprep.subr.bf16.mxu0 %v333_v10  ;;  %v383_v52 = vpack.c.bf16 %v197_v46, %v196_v45  ;;  %v79_v53 = vld [vmem:[%s769_s1 + $0x1c8] sm:$0xff]  ;;  %v81_v54 = vld [vmem:[%s769_s1 + $0x1d8] sm:$0xff]  ;;  %v351_v55 = vpack.c.bf16 %v76_v51, %v74_v50  ;;  %v78_v57 = vld [vmem:[%s769_s1 + $0x1c0] sm:$0xff] }
  0x27   :  { %375 = vmatpush1.bf16.msra.mxu1 %v374_v23  ;;  %v353_v56 = vpack.c.bf16 %v81_v54, %v79_v53  ;;  %v80_v58 = vld [vmem:[%s769_s1 + $0x1d0] sm:$0xff]  ;;  %v83_v59 = vld [vmem:[%s769_s1 + $0x1e8] sm:$0xff]  ;;  %v85_v60 = vld [vmem:[%s769_s1 + $0x1f8] sm:$0xff] }
  0x28   :  { %376 = vmatprep.subr.bf16.mxu1 %v427_v7  ;;  %v355_v61 = vpack.c.bf16 %v80_v58, %v78_v57  ;;  %v357_v62 = vpack.c.bf16 %v85_v60, %v83_v59  ;;  %v82_v63 = vld [vmem:[%s769_s1 + $0x1e0] sm:$0xff]  ;;  %v84_v0 = vld [vmem:[%s769_s1 + $0x1f0] sm:$0xff]  ;;  %v199_v5 = vld [vmem:[%s771_s3 + $0x88] sm:$0xff] }
  0x29   :  { %336 = vmatpush1.bf16.msra.mxu0 %v335_v18  ;;  %v359_v2 = vpack.c.bf16 %v84_v0, %v82_v63  ;;  %v198_v4 = vld [vmem:[%s771_s3 + $0x80] sm:$0xff]  ;;  %v200_v8 = vld [vmem:[%s771_s3 + $0x90] sm:$0xff]  ;;  %v201_v47 = vld [vmem:[%s771_s3 + $0x98] sm:$0xff] }
  0x2a   :  { %338 = vmatprep.subr.bf16.mxu0 %v337_v19  ;;  %v386_v6 = vpack.c.bf16 %v199_v5, %v198_v4  ;;  %v389_v9 = vpack.c.bf16 %v201_v47, %v200_v8  ;;  %v202_v10 = vld [vmem:[%s771_s3 + $0xa0] sm:$0xff]  ;;  %v203_v11 = vld [vmem:[%s771_s3 + $0xa8] sm:$0xff]  ;;  %v204_v13 = vld [vmem:[%s771_s3 + $0xb0] sm:$0xff] }
  0x2b   :  { %378 = vmatpush1.bf16.msra.mxu1 %v377_v32  ;;  %v392_v12 = vpack.c.bf16 %v203_v11, %v202_v10  ;;  %v205_v14 = vld [vmem:[%s771_s3 + $0xb8] sm:$0xff]  ;;  %v86_v16 = vld [vmem:[%s770_s2] sm:$0x3]  ;;  %s428_s2 = smov [#allocation2]  }
  0x2c   :  { %379 = vmatprep.subr.bf16.mxu1 %v427_v7  ;;  %v395_v15 = vpack.c.bf16 %v205_v14, %v204_v13  ;;  %v102_v17 = vrot.slane %v86_v16, %v90_v1  ;;  %v106_v18 = vrot.slane %v86_v16, %v94_v40  ;;  %s288_s18 = sshll.u32 %s428_s2, 4  ;;  %s289_s18 = int_to_ptr.vmem [resolvable:$true] %s288_s18 }
  0x2d   :  { %340 = vmatpush1.bf16.msra.mxu0 %v339_v27  ;;  %s403_s19 = scalar_lea.vmem %s289_s18, 16  ;;  %s407_s20 = scalar_lea.vmem %s289_s18, 32 }
  0x2e   :  { %342 = vmatprep.subr.bf16.mxu0 %v341_v28  ;;  %p404_p0 = scmp.ne.s32.totalorder %s289_s18, %s403_s19  ;;  %p408_p1 = scmp.lt.s32.totalorder %s289_s18, %s289_s18 }
  0x2f   :  { %381 = vmatpush1.bf16.msra.mxu1 %v380_v43  ;;  %p409_p2 = scmp.lt.s32.totalorder %s407_s20, %s403_s19 }
  0x30   :  { %382 = vmatprep.subr.bf16.mxu1 %v427_v7 }
  0x31   :  { %344 = vmatpush1.bf16.msra.mxu0 %v343_v37  ;;  %p410_p3 = por %p409_p2, %p408_p1 }
  0x32   :  { %346 = vmatprep.subr.bf16.mxu0 %v345_v38 }
  0x33   :  { %384 = vmatpush1.bf16.msra.mxu1 %v383_v52  ;;  %p411_p4 = pnand %p410_p3, %p404_p0 }
  0x34   :  { %385 = vmatprep.subr.bf16.mxu1 %v427_v7 }
  0x35   :  { %348 = vmatpush1.bf16.msra.mxu0 %v347_v48 }
  0x36   :  { %350 = vmatprep.subr.bf16.mxu0 %v349_v49 }
  0x37   :  { %387 = vmatpush1.bf16.msra.mxu1 %v386_v6 }
  0x38   :  { %388 = vmatprep.subr.bf16.mxu1 %v427_v7 }
  0x39   :  { %352 = vmatpush1.bf16.msra.mxu0 %v351_v55 }
  0x3a   :  { %354 = vmatprep.subr.bf16.mxu0 %v353_v56 }
  0x3b   :  { %390 = vmatpush1.bf16.msra.mxu1 %v389_v9 }
  0x3c   :  { %391 = vmatprep.subr.bf16.mxu1 %v427_v7 }
  0x3d   :  { %356 = vmatpush1.bf16.msra.mxu0 %v355_v61 }
  0x3e   :  { %358 = vmatprep.subr.bf16.mxu0 %v357_v62 }
  0x3f   :  { %393 = vmatpush1.bf16.msra.mxu1 %v392_v12 }
  0x40   :  { %394 = vmatprep.subr.bf16.mxu1 %v427_v7  ;;  %v206_v7 = vld [vmem:[%s772_s4] sm:$0x1] }
  0x41   :  { %360 = vmatpush1.bf16.msra.mxu0 %v359_v2 }
  0x43   :  { %396 = vmatpush1.bf16.msra.mxu1 %v395_v15 }
  0x44   :  { %174 = vmatmul.mubr.f32.vlgmr.msra.gmra.mrb[0].mxu0 %v91_v3 }
 0x117   :  { %v175_v19 = vpop.f32.mrb[0].mxu0 }
 0x118   :  { %v176_v20 = vadd.f32 %v175_v19, %v102_v17  ;;  %v177_v21 = vpop.f32.mrb[1].mxu0 }
 0x119   :  { %v178_v22 = vadd.f32 %v177_v21, %v106_v18 }
 0x11b   :  { %399 = vtanh.f32 %v178_v22 }
 0x11c   :  { %401 = vtanh.f32 %v176_v20 }
 0x125   :  { %v400_v23 = vpop.eup %399 }
 0x126   :  { %v402_v24 = vpop.eup %401  ;;  %296 = vmatprep.mubr.msk.f32.mxu1 %vm207_vm0, %v400_v23 }
 0x127   :  { %276 = vmatmul.mubr.f32.vlgmr.msra.gmra.mrb[0].mxu1 %v402_v24 }
 0x1fa   :  { %v277_v25 = vpop.f32.mrb[0].mxu1 }
 0x1fb   :  { %v278_v33 = vadd.f32 %v277_v25, %v206_v7  ;;  %v279_v40 = vpop.f32.mrb[1].mxu1 }
 0x1fd   :  { %281 = vst [vmem:[#allocation2] sm:$0x1] %v278_v33 }
 0x1fe   :  { %414 = shalt.err (!%p411_p4)
}
 0x1ff   :  { %s415_s23 = scalar_lea.hbm %s773_s5, 16 }
 0x200   :  { %p416_p5 = scmp.ne.s32.totalorder %s773_s5, %s415_s23  ;;  %p419_p6 = scmp.lt.u32.totalorder %s415_s23, %s773_s5 }
 0x202   :  { %p421_p7 = pnand %p419_p6, %p416_p5 }
 0x204   :  { %424 = shalt.err (!%p421_p7)
}
 0x205   :  { %291 = dma.vmem_to_hbm [thread:$0]  %s289_s18, 16, %s773_s5, [#allocation3]  }
 0x206   :  { %425 = dma.done.wait [#allocation3], 16  }
 0x207   :  { %426 = vsyncadd [#allocation3], 4294967280 }
 0x208   :  { %295 = vsyncpa [#allocation3], 1 }

</bundles_post_ra>
